<compile_context>
chip_gen: v5e
topology: v5e:2x2
jax: 0.10.0
libtpu: 0.0.40
codegen_flags: <defaults>
</compile_context>

<pallas_src>
import jax
import jax.numpy as jnp
from jax import lax
from jax.experimental import pallas as pl
from jax.experimental.pallas import tpu as pltpu

# lhs (out, in) contracted with rhs (batch, in) on the last dim of both -> (out, batch).
# Same "NT" dimension numbers used by the official TPU flash-attention kernel.
NT_DIM_NUMBERS = (((1,), (1,)), ((), ()))


def ffnet_kernel(x_ref, w1_ref, b1_ref, w2_ref, b2_ref, w3_ref, b3_ref, o_ref):
    # x_ref : (tile_b, d_in) f32  -- natural (batch, feature) layout straight from HBM
    # w_i   : (out, in)      bf16 -- torch nn.Linear layout, VMEM-resident across the grid
    # b_i   : (out, 1)       f32
    # o_ref : (d_out, tile_b) bf16 -- transposed: batch on the 128-lane axis (lane-dense store)
    x = x_ref[...].astype(jnp.bfloat16)                       # in-kernel cast (no wrapper pass)

    # hidden layer 0: Linear -> ReLU   (Dropout(p=0) identity; 2nd ReLU idempotent -> elided)
    # Transpose is fused into the matmul: W1 (d_h1, d_in) x X (tile_b, d_in)^T -> (d_h1, tile_b)
    h = lax.dot_general(w1_ref[...], x, NT_DIM_NUMBERS,
                        preferred_element_type=jnp.float32) + b1_ref[...]
    h = jnp.maximum(h, 0.0)                                   # f32 epilogue (v5e-safe)

    # hidden layer 1: Linear -> ReLU
    h = jnp.dot(w2_ref[...], h.astype(w2_ref.dtype),
                preferred_element_type=jnp.float32) + b2_ref[...]
    h = jnp.maximum(h, 0.0)

    # output layer: Linear (no activation)
    out = jnp.dot(w3_ref[...], h.astype(w3_ref.dtype),
                  preferred_element_type=jnp.float32) + b3_ref[...]
    o_ref[...] = out.astype(o_ref.dtype)                      # bf16, lane-dense unmasked store


def _pick_tile_b(batch, tile_b):
    """Clamp the batch tile: multiple of 128 (lane axis), and keep >= 2 grid steps whenever
    the batch allows it (both v7x TensorCores get work; v5e/v6e pipeline has overlap)."""
    tile_b = max(128, (tile_b // 128) * 128)
    if batch < 256:
        return 128
    cap = max(128, (batch // 2) // 128 * 128)   # largest 128-multiple giving >= 2 steps
    return min(tile_b, cap)


def ffnet_forward(x, params, *, tile_b=512):
    """FFNet forward as one Pallas kernel.

    x      : (B, d_in) float32 in natural layout (no wrapper transpose/cast/pad passes).
    params : (w1, b1, w2, b2, w3, b3); w_i (out, in), b_i (out, 1).
    returns: (d_out, B) bfloat16, transposed/lane-dense (batch on the lane axis).
             Consumers that need (B, d_out) can transpose on their side; keeping the
             transposed layout end-to-end avoids an extra HBM pass.
    """
    w1, b1, w2, b2, w3, b3 = params
    B, d_in = x.shape
    d_h1, d_h2, d_out = w1.shape[0], w2.shape[0], w3.shape[0]

    tb = _pick_tile_b(B, tile_b)
    grid = (pl.cdiv(B, tb),)   # partial last block: OOB batch columns are independent garbage
                               # and the partial output block writeback is masked by Pallas.

    def resident(shape):
        # constant block index -> DMA'd once, stays VMEM-resident across all batch tiles
        return pl.BlockSpec(shape, lambda i: (0, 0))

    out_t = pl.pallas_call(
        ffnet_kernel,
        out_shape=jax.ShapeDtypeStruct((d_out, B), jnp.bfloat16),
        grid_spec=pl.GridSpec(
            grid=grid,
            in_specs=[
                pl.BlockSpec((tb, d_in), lambda i: (i, 0)),        # x batch tile, natural layout
                resident((d_h1, d_in)), resident((d_h1, 1)),
                resident((d_h2, d_h1)), resident((d_h2, 1)),
                resident((d_out, d_h2)), resident((d_out, 1)),
            ],
            out_specs=pl.BlockSpec((d_out, tb), lambda i: (0, i)),  # lane-dense store
        ),
        compiler_params=pltpu.CompilerParams(
            dimension_semantics=("parallel",)),
    )(
        x,
        w1.astype(jnp.bfloat16), b1.astype(jnp.float32),
        w2.astype(jnp.bfloat16), b2.astype(jnp.float32),
        w3.astype(jnp.bfloat16), b3.astype(jnp.float32),
    )
    return out_t


ffnet_forward_jit = jax.jit(ffnet_forward, static_argnames=("tile_b",))


def init_params(key, shape):
    """Deterministic init mimicking torch.nn.Linear default (uniform +/- 1/sqrt(fan_in)).
    Weights in torch layout (out_features, in_features), biases as (out_features, 1)."""
    params = []
    for ii in range(len(shape) - 1):
        fan_in, fan_out = shape[ii], shape[ii + 1]
        key, kw, kb = jax.random.split(key, 3)
        bound = 1.0 / jnp.sqrt(fan_in)
        w = jax.random.uniform(kw, (fan_out, fan_in), jnp.float32, -bound, bound)
        b = jax.random.uniform(kb, (fan_out, 1), jnp.float32, -bound, bound)
        params += [w, b]
    return tuple(params)


def ffnet_reference(x, params):
    """Pure-JAX reference matching the PyTorch forward loop with the same bf16-operand /
    f32-accumulation numerics as the kernel. Returns (B, d_out) f32."""
    w1, b1, w2, b2, w3, b3 = params
    bf = jnp.bfloat16
    h = jnp.dot(x.astype(bf), w1.T.astype(bf), preferred_element_type=jnp.float32) + b1[:, 0]
    h = jnp.maximum(h, 0.0)            # dropout(p=0) identity; 2nd ReLU idempotent
    h = jnp.dot(h.astype(bf), w2.T.astype(bf), preferred_element_type=jnp.float32) + b2[:, 0]
    h = jnp.maximum(h, 0.0)
    return jnp.dot(h.astype(bf), w3.T.astype(bf), preferred_element_type=jnp.float32) + b3[:, 0]


if __name__ == "__main__":
    # network shape: [input=16, hidden=32, hidden=32, output=8]
    net_shape = [16, 32, 32, 8]
    key = jax.random.PRNGKey(0)
    kx, kp = jax.random.split(key)

    B = 2048          # tile_b=512 -> 4 grid steps: both v7x TCs busy, pipeline has overlap
    x = jax.random.normal(kx, (B, net_shape[0]), jnp.float32)
    params = init_params(kp, net_shape)

    out_t = ffnet_forward_jit(x, params)          # (d_out, B) bf16, transposed/lane-dense
    out_t = jax.block_until_ready(out_t)

    ref = ffnet_reference(x, params)              # (B, d_out) f32
    assert out_t.shape == (net_shape[-1], B)
    assert out_t.dtype == jnp.bfloat16
    # transpose/cast here are test-only (not part of the benchmarked forward path);
    # tolerance covers the bf16 output quantization on O(1) values.
    assert jnp.allclose(out_t.astype(jnp.float32).T, ref, atol=2e-2, rtol=2e-2), \
        "mismatch vs pure-JAX reference"

    print("KERNEL_OK")
</pallas_src>

<mosaic_0001>
module attributes {stable_mosaic.version = 11 : i64} {
  func.func @ffnet_kernel(%arg0: i32, %arg1: memref<512x16xf32, #tpu.memory_space<vmem>>, %arg2: memref<32x16xbf16, #tpu.memory_space<vmem>>, %arg3: memref<32x1xf32, #tpu.memory_space<vmem>>, %arg4: memref<32x32xbf16, #tpu.memory_space<vmem>>, %arg5: memref<32x1xf32, #tpu.memory_space<vmem>>, %arg6: memref<8x32xbf16, #tpu.memory_space<vmem>>, %arg7: memref<8x1xf32, #tpu.memory_space<vmem>>, %arg8: memref<8x512xbf16, #tpu.memory_space<vmem>>) attributes {dimension_semantics = [#tpu.dimension_semantics<parallel>], iteration_bounds = array<i64: 4>, scalar_prefetch = 0 : i64, scratch_operands = 0 : i64, tpu.core_type = #tpu.core_type<tc>, window_params = [{transform_indices = @transform_0, window_bounds = array<i64: 512, 16>}, {pipeline_mode = #tpu.pipeline_mode<synchronous>, transform_indices = @transform_1, window_bounds = array<i64: 32, 16>}, {pipeline_mode = #tpu.pipeline_mode<synchronous>, transform_indices = @transform_2, window_bounds = array<i64: 32, 1>}, {pipeline_mode = #tpu.pipeline_mode<synchronous>, transform_indices = @transform_3, window_bounds = array<i64: 32, 32>}, {pipeline_mode = #tpu.pipeline_mode<synchronous>, transform_indices = @transform_4, window_bounds = array<i64: 32, 1>}, {pipeline_mode = #tpu.pipeline_mode<synchronous>, transform_indices = @transform_5, window_bounds = array<i64: 8, 32>}, {pipeline_mode = #tpu.pipeline_mode<synchronous>, transform_indices = @transform_6, window_bounds = array<i64: 8, 1>}, {transform_indices = @transform_7, window_bounds = array<i64: 8, 512>}]} {
    %c0 = arith.constant 0 : index
    %c0_0 = arith.constant 0 : index
    %0 = vector.load %arg1[%c0, %c0_0] : memref<512x16xf32, #tpu.memory_space<vmem>>, vector<512x16xf32>
    %1 = arith.truncf %0 : vector<512x16xf32> to vector<512x16xbf16>
    %c0_1 = arith.constant 0 : index
    %c0_2 = arith.constant 0 : index
    %2 = vector.load %arg2[%c0_1, %c0_2] : memref<32x16xbf16, #tpu.memory_space<vmem>>, vector<32x16xbf16>
    %cst = arith.constant dense<0.000000e+00> : vector<32x512xf32>
    %3 = tpu.matmul %2, %1, %cst {dimension_numbers = #tpu.dot_dimension_numbers<[1], [1], [0], [0], [0, 0, 1, 0], [], []>} : vector<32x16xbf16>, vector<512x16xbf16>, vector<32x512xf32> -> vector<32x512xf32>
    %c0_3 = arith.constant 0 : index
    %c0_4 = arith.constant 0 : index
    %4 = vector.load %arg3[%c0_3, %c0_4] : memref<32x1xf32, #tpu.memory_space<vmem>>, vector<32x1xf32>
    %5 = vector.broadcast %4 : vector<32x1xf32> to vector<32x512xf32>
    %6 = arith.addf %3, %5 : vector<32x512xf32>
    %cst_5 = arith.constant 0.000000e+00 : f32
    %7 = vector.broadcast %cst_5 : f32 to vector<32x512xf32>
    %8 = arith.maximumf %6, %7 : vector<32x512xf32>
    %c0_6 = arith.constant 0 : index
    %c0_7 = arith.constant 0 : index
    %9 = vector.load %arg4[%c0_6, %c0_7] : memref<32x32xbf16, #tpu.memory_space<vmem>>, vector<32x32xbf16>
    %10 = arith.truncf %8 : vector<32x512xf32> to vector<32x512xbf16>
    %cst_8 = arith.constant dense<0.000000e+00> : vector<32x512xf32>
    %11 = tpu.matmul %9, %10, %cst_8 {dimension_numbers = #tpu.dot_dimension_numbers<[1], [0], [0], [1], [0, 0, 1, 1], [], []>} : vector<32x32xbf16>, vector<32x512xbf16>, vector<32x512xf32> -> vector<32x512xf32>
    %c0_9 = arith.constant 0 : index
    %c0_10 = arith.constant 0 : index
    %12 = vector.load %arg5[%c0_9, %c0_10] : memref<32x1xf32, #tpu.memory_space<vmem>>, vector<32x1xf32>
    %13 = vector.broadcast %12 : vector<32x1xf32> to vector<32x512xf32>
    %14 = arith.addf %11, %13 : vector<32x512xf32>
    %cst_11 = arith.constant 0.000000e+00 : f32
    %15 = vector.broadcast %cst_11 : f32 to vector<32x512xf32>
    %16 = arith.maximumf %14, %15 : vector<32x512xf32>
    %c0_12 = arith.constant 0 : index
    %c0_13 = arith.constant 0 : index
    %17 = vector.load %arg6[%c0_12, %c0_13] : memref<8x32xbf16, #tpu.memory_space<vmem>>, vector<8x32xbf16>
    %18 = arith.truncf %16 : vector<32x512xf32> to vector<32x512xbf16>
    %cst_14 = arith.constant dense<0.000000e+00> : vector<8x512xf32>
    %19 = tpu.matmul %17, %18, %cst_14 {dimension_numbers = #tpu.dot_dimension_numbers<[1], [0], [0], [1], [0, 0, 1, 1], [], []>} : vector<8x32xbf16>, vector<32x512xbf16>, vector<8x512xf32> -> vector<8x512xf32>
    %c0_15 = arith.constant 0 : index
    %c0_16 = arith.constant 0 : index
    %20 = vector.load %arg7[%c0_15, %c0_16] : memref<8x1xf32, #tpu.memory_space<vmem>>, vector<8x1xf32>
    %21 = vector.broadcast %20 : vector<8x1xf32> to vector<8x512xf32>
    %22 = arith.addf %19, %21 : vector<8x512xf32>
    %23 = arith.truncf %22 : vector<8x512xf32> to vector<8x512xbf16>
    %c0_17 = arith.constant 0 : index
    %c0_18 = arith.constant 0 : index
    %24 = vector.load %arg8[%c0_17, %c0_18] : memref<8x512xbf16, #tpu.memory_space<vmem>>, vector<8x512xbf16>
    tpu.vector_store %arg8[%c0_17, %c0_18], %23 {strides = array<i32>} : memref<8x512xbf16, #tpu.memory_space<vmem>>, vector<8x512xbf16>,
    return
  }
  func.func @transform_0(%arg0: i32) -> (i32, i32) {
    %c0_i32 = arith.constant 0 : i32
    %c0_i32_0 = arith.constant 0 : i32
    return %arg0, %c0_i32 : i32, i32
  }
  func.func @transform_1(%arg0: i32) -> (i32, i32) {
    %c0_i32 = arith.constant 0 : i32
    %c0_i32_0 = arith.constant 0 : i32
    %c0_i32_1 = arith.constant 0 : i32
    return %c0_i32, %c0_i32_0 : i32, i32
  }
  func.func @transform_2(%arg0: i32) -> (i32, i32) {
    %c0_i32 = arith.constant 0 : i32
    %c0_i32_0 = arith.constant 0 : i32
    %c0_i32_1 = arith.constant 0 : i32
    return %c0_i32, %c0_i32_0 : i32, i32
  }
  func.func @transform_3(%arg0: i32) -> (i32, i32) {
    %c0_i32 = arith.constant 0 : i32
    %c0_i32_0 = arith.constant 0 : i32
    %c0_i32_1 = arith.constant 0 : i32
    return %c0_i32, %c0_i32_0 : i32, i32
  }
  func.func @transform_4(%arg0: i32) -> (i32, i32) {
    %c0_i32 = arith.constant 0 : i32
    %c0_i32_0 = arith.constant 0 : i32
    %c0_i32_1 = arith.constant 0 : i32
    return %c0_i32, %c0_i32_0 : i32, i32
  }
  func.func @transform_5(%arg0: i32) -> (i32, i32) {
    %c0_i32 = arith.constant 0 : i32
    %c0_i32_0 = arith.constant 0 : i32
    %c0_i32_1 = arith.constant 0 : i32
    return %c0_i32, %c0_i32_0 : i32, i32
  }
  func.func @transform_6(%arg0: i32) -> (i32, i32) {
    %c0_i32 = arith.constant 0 : i32
    %c0_i32_0 = arith.constant 0 : i32
    %c0_i32_1 = arith.constant 0 : i32
    return %c0_i32, %c0_i32_0 : i32, i32
  }
  func.func @transform_7(%arg0: i32) -> (i32, i32) {
    %c0_i32 = arith.constant 0 : i32
    %c0_i32_0 = arith.constant 0 : i32
    return %c0_i32, %arg0 : i32, i32
  }
}

</mosaic_0001>

<bundles_post_ra>
// kernel: ffnet_forward.1
= control target key start
LH: loop header
LB: loop body
LE: loop exit
PB: predicated region body
PF: predicated region fallthrough
CT: control target
= control target key end

     0   :  { %12 = vsyncpa [#allocation3], 0  ;;  %s1350_s0 = inlined_call_operand.vmem [shape: f32[2048,16], index: 0, kind: input, shape index: {}]   ;;  %s1351_s1 = inlined_call_operand.vmem [shape: bf16[32,16], index: 1, kind: input, shape index: {}]   ;;  %s1352_s2 = inlined_call_operand.vmem [shape: f32[32,1], index: 2, kind: input, shape index: {}]   ;;  %s1353_s3 = inlined_call_operand.vmem [shape: bf16[32,32], index: 3, kind: input, shape index: {}]   ;;  %s1354_s4 = inlined_call_operand.vmem [shape: f32[32,1], index: 4, kind: input, shape index: {}]   ;;  %s1355_s5 = inlined_call_operand.vmem [shape: bf16[8,32], index: 5, kind: input, shape index: {}]   ;;  %s1356_s6 = inlined_call_operand.vmem [shape: f32[8,1], index: 6, kind: input, shape index: {}]   ;;  %s1357_s7 = inlined_call_operand.hbm [shape: bf16[8,2048], index: 7, kind: output, shape index: {}]  }
   0x1   :  { %14 = vsyncpa [#allocation3 + $0x1], 0  ;;  %s1106_s24 = smov 0   ;;  %s1108_s25 = smov 0  }
   0x2   :  { %s1110_s26 = smov 0   ;;  %s1112_s27 = smov 0  }
   0x3 LB: > { %s1127_s28 = sadd.s32 4294967295, %s1063_s27   ;;  %s905_s29 = sadd.s32 4294967294, %s1063_s27   ;;  %s1063_s27 = sphi %s1112_s27, %s1363_s27   ;;  %s1059_s26 = sphi %s1110_s26, %s1362_s26   ;;  %s1055_s25 = sphi %s1108_s25, %s1361_s25   ;;  %s1051_s24 = sphi %s1106_s24, %s1360_s24  }
   0x4   : > { %s1131_s30 = sadd.s32 1, %s1063_s27   ;;  %s179_s8 = sadd.s32 1, %s1059_s26 }
   0x5   : > { %s176_s9 = ssub.s32 %s1063_s27, %s1131_s30  ;;  %p189_p0 = scmp.ne.s32.totalorder %s1059_s26, %s1055_s25 }
   0x6   : > { %p177_p1 = scmp.eq.s32.totalorder %s176_s9, 0  ;;  %p190_p2 = scmp.eq.s32.totalorder %s1127_s28, 3 }
   0x7   : > { %p195_p3 = scmp.ne.s32.totalorder %s1055_s25, %s1051_s24  ;;  %p196_p4 = scmp.eq.s32.totalorder %s905_s29, 3 }
   0x8   : > { %s1142_s10 = scalar_select %p177_p1, %s1059_s26, %s179_s8  }
   0x9   : > { %p1144_p5 = por %p190_p2, %p189_p0  ;;  %p1148_p6 = por %p196_p4, %p195_p3 }
   0xa   : > { %p908_p7 = scmp.ge.s32.totalorder %s1063_s27, 1  ;;  %p241_p8 = scmp.lt.s32.totalorder %s1063_s27, 5 }
   0xc   : > { %p242_p9 = pnand %p908_p7, %p241_p8 }
   0xd   : > { %s910_s13 = sshll.u32 (!%p242_p9), %s1127_s28, 6  ;;  %s270_s18 = sand.u32 (!%p242_p9), 1, %s1055_s25  }
   0xe   : > { %245 = sbr.rel (%p242_p9) target bundleno = 570 (0x23a), region = 48  ;;  %p274_p10 = scmp.lt.s32.totalorder (!%p242_p9), %s910_s13, 255 }
   0xf   : > { %s909_s19 = sshll.u32 (!%p242_p9), %s270_s18, 4  ;;  %s957_s21 = sshll.u32 (!%p242_p9), %s1127_s28, 4 }
  0x10   : > { %s272_s20 = scalar_lea.vmem (!%p242_p9), [#allocation2], %s909_s19  ;;  %s841_s29 = scalar_lea.hbm (!%p242_p9), %s1357_s7, %s957_s21 }
  0x11   : > { %s843_s8 = sshll.u32 (!%p242_p9), %s272_s20, 4  ;;  %s845_s9 = sshll.u32 (!%p242_p9), %s841_s29, 4  ;;  %s844_s8 = int_to_ptr.vmem [resolvable:$true] %s843_s8  ;;  %s846_s9 = int_to_ptr.hbm [resolvable:$true] %s845_s9 }
  0x13   : > { %s1365_s13 = smov (!%p274_p10, %s910_s13), 255  ;;  %vm415_vm0 = vcmask 130048   ;;  %vm656_vm1 = vcmask 261120  }
  0x14   : > { %s911_s14 = sshll.u32 %s1365_s13, 3  ;;  %s830_s13 = scalar_lea.sflag [#allocation3], %s270_s18 }
  0x15   : > { %s1158_s17 = scalar_lea.vmem %s1350_s0, %s911_s14  ;;  %s1015_s14 = sshra.s32 %s846_s9, 4  ;;  %s1016_s14 = int_to_ptr.hbm [resolvable:$true] %s1015_s14 }
  0x16   : > { %v295_v0 = vld [vmem:[%s1158_s17 + $0x70] sm:$0xff]  ;;  %v296_v1 = vld [vmem:[%s1158_s17 + $0x78] sm:$0xff]  ;;  %v293_v11 = vld [vmem:[%s1158_s17 + $0x60] sm:$0xff]  ;;  %s1017_s15 = scalar_lea.hbm %s1016_s14, 16  ;;  %p1022_p0 = scmp.lt.s32.totalorder %s1016_s14, %s1357_s7 }
  0x17   : > { %v311_v2 = vld [vmem:[%s1158_s17 + $0xf0] sm:$0xff]  ;;  %v352_v3 = vpack.c.bf16 %v296_v1, %v295_v0  ;;  %v312_v4 = vld [vmem:[%s1158_s17 + $0xf8] sm:$0xff]  ;;  %v294_v14 = vld [vmem:[%s1158_s17 + $0x68] sm:$0xff]  ;;  %p1018_p11 = scmp.ne.s32.totalorder %s1016_s14, %s1017_s15 }
  0x18   : > { %v327_v5 = vld [vmem:[%s1158_s17 + $0x170] sm:$0xff]  ;;  %v328_v6 = vld [vmem:[%s1158_s17 + $0x178] sm:$0xff]  ;;  %v360_v7 = vpack.c.bf16 %v312_v4, %v311_v2  ;;  %v309_v15 = vld [vmem:[%s1158_s17 + $0xe0] sm:$0xff]  ;;  %v351_v23 = vpack.c.bf16 %v294_v14, %v293_v11 }
  0x19   : > { %v368_v8 = vpack.c.bf16 %v328_v6, %v327_v5  ;;  %v343_v9 = vld [vmem:[%s1158_s17 + $0x1f0] sm:$0xff]  ;;  %v344_v10 = vld [vmem:[%s1158_s17 + $0x1f8] sm:$0xff]  ;;  %v444_v12 = vsel %vm415_vm0, %v352_v3, 0  ;;  %v310_v16 = vld [vmem:[%s1158_s17 + $0xe8] sm:$0xff]  ;;  %p1019_p12 = pnand %p1018_p11, %p1144_p5 }
  0x1a   : > { %v376_v13 = vpack.c.bf16 %v344_v10, %v343_v9  ;;  %518 = vmatpush.bf16.xpose.msra.mxu0 %v444_v12  ;;  %v468_v17 = vsel %vm415_vm0, %v360_v7, 0  ;;  %v325_v19 = vld [vmem:[%s1158_s17 + $0x160] sm:$0xff]  ;;  %v326_v20 = vld [vmem:[%s1158_s17 + $0x168] sm:$0xff]  ;;  %v359_v25 = vpack.c.bf16 %v310_v16, %v309_v15  ;;  %v441_v28 = vsel %vm415_vm0, %v351_v23, 0  ;;  %v291_v31 = vld [vmem:[%s1158_s17 + $0x50] sm:$0xff] }
  0x1b   : > { %v492_v18 = vsel %vm415_vm0, %v368_v8, 0  ;;  %v341_v21 = vld [vmem:[%s1158_s17 + $0x1e0] sm:$0xff]  ;;  %537 = vmatpush.bf16.xpose.msra.mxu1 %v468_v17  ;;  %v342_v24 = vld [vmem:[%s1158_s17 + $0x1e8] sm:$0xff]  ;;  %v367_v26 = vpack.c.bf16 %v326_v20, %v325_v19  ;;  %v292_v32 = vld [vmem:[%s1158_s17 + $0x58] sm:$0xff]  ;;  %p1020_p13 = pneg %p1019_p12 }
  0x1c   : > { %556 = vmatpush.bf16.xpose.msra.mxu2 %v492_v18  ;;  %v516_v22 = vsel %vm415_vm0, %v376_v13, 0  ;;  %v375_v27 = vpack.c.bf16 %v342_v24, %v341_v21  ;;  %v465_v29 = vsel %vm415_vm0, %v359_v25, 0  ;;  %v307_v33 = vld [vmem:[%s1158_s17 + $0xd0] sm:$0xff]  ;;  %v308_v35 = vld [vmem:[%s1158_s17 + $0xd8] sm:$0xff]  ;;  %v350_v40 = vpack.c.bf16 %v292_v32, %v291_v31  ;;  %v289_v47 = vld [vmem:[%s1158_s17 + $0x40] sm:$0xff] }
  0x1d   : > { %575 = vmatpush.bf16.xpose.msra.mxu3 %v516_v22  ;;  %v489_v30 = vsel %vm415_vm0, %v367_v26, 0  ;;  %v323_v36 = vld [vmem:[%s1158_s17 + $0x150] sm:$0xff]  ;;  %v324_v37 = vld [vmem:[%s1158_s17 + $0x158] sm:$0xff]  ;;  %v358_v41 = vpack.c.bf16 %v308_v35, %v307_v33  ;;  %v290_v48 = vld [vmem:[%s1158_s17 + $0x48] sm:$0xff] }
  0x1e   : > { %v513_v34 = vsel %vm415_vm0, %v375_v27, 0  ;;  %v339_v38 = vld [vmem:[%s1158_s17 + $0x1d0] sm:$0xff]  ;;  %v340_v39 = vld [vmem:[%s1158_s17 + $0x1d8] sm:$0xff]  ;;  %v366_v42 = vpack.c.bf16 %v324_v37, %v323_v36  ;;  %v438_v44 = vsel %vm415_vm0, %v350_v40, 0  ;;  %v305_v49 = vld [vmem:[%s1158_s17 + $0xc0] sm:$0xff]  ;;  %v349_v56 = vpack.c.bf16 %v290_v48, %v289_v47 }
  0x1f   : > { %v374_v43 = vpack.c.bf16 %v340_v39, %v339_v38  ;;  %v462_v45 = vsel %vm415_vm0, %v358_v41, 0  ;;  %v306_v51 = vld [vmem:[%s1158_s17 + $0xc8] sm:$0xff]  ;;  %v321_v52 = vld [vmem:[%s1158_s17 + $0x140] sm:$0xff]  ;;  %v287_v63 = vld [vmem:[%s1158_s17 + $0x30] sm:$0xff]  ;;  %v1065_v27 = vmov 0  }
  0x20   : > { %v486_v46 = vsel %vm415_vm0, %v366_v42, 0  ;;  %v322_v53 = vld [vmem:[%s1158_s17 + $0x148] sm:$0xff]  ;;  %v337_v54 = vld [vmem:[%s1158_s17 + $0x1c0] sm:$0xff]  ;;  %v357_v57 = vpack.c.bf16 %v306_v51, %v305_v49  ;;  %v435_v60 = vsel %vm415_vm0, %v349_v56, 0  ;;  %v288_v0 = vld [vmem:[%s1158_s17 + $0x38] sm:$0xff]  ;;  %999 = vset.pattern.permute.xlu1 %v1065_v27  ;;  %998 = vset.pattern.permute.xlu0 %v1065_v27 }
  0x21   : > { %v510_v50 = vsel %vm415_vm0, %v374_v43, 0  ;;  %v338_v55 = vld [vmem:[%s1158_s17 + $0x1c8] sm:$0xff]  ;;  %v365_v58 = vpack.c.bf16 %v322_v53, %v321_v52  ;;  %v303_v1 = vld [vmem:[%s1158_s17 + $0xb0] sm:$0xff]  ;;  %v304_v3 = vld [vmem:[%s1158_s17 + $0xb8] sm:$0xff]  ;;  %v348_v8 = vpack.c.bf16 %v288_v0, %v287_v63  ;;  %1000 = vset.pattern.permute.xlu2 %v1065_v27 }
  0x22   : > { %519 = vmatpush.bf16.xpose.msra.mxu0 %v441_v28  ;;  %v373_v59 = vpack.c.bf16 %v338_v55, %v337_v54  ;;  %v459_v61 = vsel %vm415_vm0, %v357_v57, 0  ;;  %v319_v4 = vld [vmem:[%s1158_s17 + $0x130] sm:$0xff]  ;;  %v320_v5 = vld [vmem:[%s1158_s17 + $0x138] sm:$0xff]  ;;  %v356_v9 = vpack.c.bf16 %v304_v3, %v303_v1  ;;  %v285_v15 = vld [vmem:[%s1158_s17 + $0x20] sm:$0xff] }
  0x23   : > { %538 = vmatpush.bf16.xpose.msra.mxu1 %v465_v29  ;;  %v483_v62 = vsel %vm415_vm0, %v365_v58, 0  ;;  %v335_v6 = vld [vmem:[%s1158_s17 + $0x1b0] sm:$0xff]  ;;  %v336_v7 = vld [vmem:[%s1158_s17 + $0x1b8] sm:$0xff]  ;;  %v364_v10 = vpack.c.bf16 %v320_v5, %v319_v4  ;;  %v432_v12 = vsel %vm415_vm0, %v348_v8, 0  ;;  %v286_v16 = vld [vmem:[%s1158_s17 + $0x28] sm:$0xff] }
  0x24   : > { %557 = vmatpush.bf16.xpose.msra.mxu2 %v489_v30  ;;  %v507_v2 = vsel %vm415_vm0, %v373_v59, 0  ;;  %v372_v11 = vpack.c.bf16 %v336_v7, %v335_v6  ;;  %v456_v13 = vsel %vm415_vm0, %v356_v9, 0  ;;  %v301_v17 = vld [vmem:[%s1158_s17 + $0xa0] sm:$0xff]  ;;  %v302_v19 = vld [vmem:[%s1158_s17 + $0xa8] sm:$0xff]  ;;  %v347_v24 = vpack.c.bf16 %v286_v16, %v285_v15  ;;  %v283_v32 = vld [vmem:[%s1158_s17 + $0x10] sm:$0xff] }
  0x25   : > { %576 = vmatpush.bf16.xpose.msra.mxu3 %v513_v34  ;;  %v480_v14 = vsel %vm415_vm0, %v364_v10, 0  ;;  %v317_v20 = vld [vmem:[%s1158_s17 + $0x120] sm:$0xff]  ;;  %v318_v21 = vld [vmem:[%s1158_s17 + $0x128] sm:$0xff]  ;;  %v355_v25 = vpack.c.bf16 %v302_v19, %v301_v17  ;;  %v284_v33 = vld [vmem:[%s1158_s17 + $0x18] sm:$0xff] }
  0x26   : > { %v504_v18 = vsel %vm415_vm0, %v372_v11, 0  ;;  %v333_v22 = vld [vmem:[%s1158_s17 + $0x1a0] sm:$0xff]  ;;  %v334_v23 = vld [vmem:[%s1158_s17 + $0x1a8] sm:$0xff]  ;;  %v363_v26 = vpack.c.bf16 %v318_v21, %v317_v20  ;;  %v429_v29 = vsel %vm415_vm0, %v347_v24, 0  ;;  %v299_v34 = vld [vmem:[%s1158_s17 + $0x90] sm:$0xff]  ;;  %v346_v41 = vpack.c.bf16 %v284_v33, %v283_v32 }
  0x27   : > { %v371_v28 = vpack.c.bf16 %v334_v23, %v333_v22  ;;  %v453_v30 = vsel %vm415_vm0, %v355_v25, 0  ;;  %v300_v36 = vld [vmem:[%s1158_s17 + $0x98] sm:$0xff]  ;;  %v315_v37 = vld [vmem:[%s1158_s17 + $0x110] sm:$0xff]  ;;  %v281_v48 = vld [vmem:[%s1158_s17] sm:$0xff] }
  0x28   : > { %v477_v31 = vsel %vm415_vm0, %v363_v26, 0  ;;  %v316_v38 = vld [vmem:[%s1158_s17 + $0x118] sm:$0xff]  ;;  %v331_v39 = vld [vmem:[%s1158_s17 + $0x190] sm:$0xff]  ;;  %v354_v42 = vpack.c.bf16 %v300_v36, %v299_v34  ;;  %v282_v49 = vld [vmem:[%s1158_s17 + $0x8] sm:$0xff] }
  0x29   : > { %v501_v35 = vsel %vm415_vm0, %v371_v28, 0  ;;  %v332_v40 = vld [vmem:[%s1158_s17 + $0x198] sm:$0xff]  ;;  %v362_v43 = vpack.c.bf16 %v316_v38, %v315_v37  ;;  %v298_v52 = vld [vmem:[%s1158_s17 + $0x88] sm:$0xff]  ;;  %v313_v53 = vld [vmem:[%s1158_s17 + $0x100] sm:$0xff]  ;;  %v345_v57 = vpack.c.bf16 %v282_v49, %v281_v48 }
  0x2a   : > { %520 = vmatpush.bf16.xpose.msra.mxu0 %v438_v44  ;;  %v370_v44 = vpack.c.bf16 %v332_v40, %v331_v39  ;;  %v314_v54 = vld [vmem:[%s1158_s17 + $0x108] sm:$0xff]  ;;  %v329_v55 = vld [vmem:[%s1158_s17 + $0x180] sm:$0xff]  ;;  %v383_v58 = vld [vmem:[%s1352_s2 + $0x10] sm:$0xff] }
  0x2b   : > { %539 = vmatpush.bf16.xpose.msra.mxu1 %v462_v45  ;;  %v426_v45 = vsel %vm415_vm0, %v346_v41, 0  ;;  %v474_v47 = vsel %vm415_vm0, %v362_v43, 0  ;;  %v330_v56 = vld [vmem:[%s1158_s17 + $0x188] sm:$0xff]  ;;  %v381_v59 = vld [vmem:[%s1352_s2] sm:$0xff]  ;;  %397 = vperm.xlu0 %998, %v383_v58   ;;  %v423_v63 = vsel %vm415_vm0, %v345_v57, 0  ;;  %v384_v3 = vld [vmem:[%s1352_s2 + $0x18] sm:$0xff] }
  0x2c   : > { %558 = vmatpush.bf16.xpose.msra.mxu2 %v486_v46  ;;  %v450_v46 = vsel %vm415_vm0, %v354_v42, 0  ;;  %v498_v51 = vsel %vm415_vm0, %v370_v44, 0  ;;  %387 = vperm.xlu1 %999, %v381_v59   ;;  %v382_v4 = vld [vmem:[%s1352_s2 + $0x8] sm:$0xff]  ;;  %v953_v5 = vld [vmem:[%s1351_s1] sm:$0xff] }
  0x2d   : > { %577 = vmatpush.bf16.xpose.msra.mxu3 %v510_v50  ;;  %v297_v50 = vld [vmem:[%s1158_s17 + $0x80] sm:$0xff]  ;;  %v623_v7 = vld [vmem:[%s1354_s4 + $0x8] sm:$0xff]  ;;  %s1021_s17 = scalar_lea.hbm %s1357_s7, 64 }
  0x2e   : > { %v622_v6 = vld [vmem:[%s1354_s4] sm:$0xff]  ;;  %v954_v8 = vld [vmem:[%s1351_s1 + $0x8] sm:$0xff]  ;;  %p1023_p1 = scmp.lt.s32.totalorder %s1021_s17, %s1017_s15 }
  0x2f   : > { %v955_v59 = vld [vmem:[%s1353_s3] sm:$0xff] }
  0x30   : > { %p1024_p2 = por %p1023_p1, %p1022_p0 }
  0x32   : > { %521 = vmatpush.bf16.xpose.msra.mxu0 %v435_v60  ;;  %v353_v60 = vpack.c.bf16 %v298_v52, %v297_v50  ;;  %p1025_p3 = pnand %p1024_p2, %p1020_p13 }
  0x33   : > { %540 = vmatpush.bf16.xpose.msra.mxu1 %v459_v61  ;;  %v361_v61 = vpack.c.bf16 %v314_v54, %v313_v53  ;;  %402 = vperm.xlu0 %998, %v384_v3   ;;  %v625_v3 = vld [vmem:[%s1354_s4 + $0x18] sm:$0xff] }
  0x34   : > { %559 = vmatpush.bf16.xpose.msra.mxu2 %v483_v62  ;;  %v369_v62 = vpack.c.bf16 %v330_v56, %v329_v55  ;;  %v447_v0 = vsel %vm415_vm0, %v353_v60, 0  ;;  %392 = vperm.xlu1 %999, %v382_v4  }
  0x35   : > { %578 = vmatpush.bf16.xpose.msra.mxu3 %v507_v2  ;;  %v471_v1 = vsel %vm415_vm0, %v361_v61, 0 }
  0x36   : > { %v495_v2 = vsel %vm415_vm0, %v369_v62, 0 }
  0x3a   : > { %522 = vmatpush.bf16.xpose.msra.mxu0 %v432_v12 }
  0x3b   : > { %541 = vmatpush.bf16.xpose.msra.mxu1 %v456_v13  ;;  %628 = vperm.xlu0 %998, %v622_v6  }
  0x3c   : > { %560 = vmatpush.bf16.xpose.msra.mxu2 %v480_v14  ;;  %633 = vperm.xlu1 %999, %v623_v7  }
  0x3d   : > { %579 = vmatpush.bf16.xpose.msra.mxu3 %v504_v18 }
  0x42   : > { %523 = vmatpush.bf16.xpose.msra.mxu0 %v429_v29 }
  0x43   : > { %542 = vmatpush.bf16.xpose.msra.mxu1 %v453_v30 }
  0x44   : > { %561 = vmatpush.bf16.xpose.msra.mxu2 %v477_v31 }
  0x45   : > { %580 = vmatpush.bf16.xpose.msra.mxu3 %v501_v35 }
  0x4a   : > { %524 = vmatpush.bf16.xpose.msra.mxu0 %v426_v45 }
  0x4b   : > { %543 = vmatpush.bf16.xpose.msra.mxu1 %v450_v46  ;;  %v624_v46 = vld [vmem:[%s1354_s4 + $0x10] sm:$0xff] }
  0x4c   : > { %562 = vmatpush.bf16.xpose.msra.mxu2 %v474_v47  ;;  %638 = vperm.xlu2 %1000, %v624_v46  }
  0x4d   : > { %581 = vmatpush.bf16.xpose.msra.mxu3 %v498_v51 }
  0x52   : > { %525 = vmatpush.bf16.xpose.msra.mxu0 %v423_v63 }
  0x53   : > { %544 = vmatpush.bf16.xpose.msra.mxu1 %v447_v0 }
  0x54   : > { %563 = vmatpush.bf16.xpose.msra.mxu2 %v471_v1  ;;  %643 = vperm.xlu2 %1000, %v625_v3  }
  0x55   : > { %582 = vmatpush.bf16.xpose.msra.mxu3 %v495_v2 }
  0x59   : > { %920 = vmatmul.msk.bf16.vlgmr.msra.gmra.mxu0 %vm415_vm0, %v953_v5 }
  0x5a   : > { %922 = vmatmul.msk.bf16.vlgmr.msra.gmra.mxu1 %vm415_vm0, %v953_v5 }
  0x5b   : > { %924 = vmatmul.msk.bf16.vlgmr.msra.gmra.mxu2 %vm415_vm0, %v953_v5 }
  0x5c   : > { %926 = vmatmul.msk.bf16.vlgmr.msra.gmra.mxu3 %vm415_vm0, %v953_v5 }
  0x69   : > { %921 = vmatmul.msk.bf16.gmra.mxu0 %vm415_vm0, %v954_v8 }
  0x6a   : > { %923 = vmatmul.msk.bf16.gmra.mxu1 %vm415_vm0, %v954_v8 }
  0x6b   : > { %925 = vmatmul.msk.bf16.gmra.mxu2 %vm415_vm0, %v954_v8 }
  0x6c   : > { %927 = vmatmul.msk.bf16.gmra.mxu3 %vm415_vm0, %v954_v8  ;;  %v764_v8 = vld [vmem:[%s1356_s6] sm:$0xff] }
  0x6d   : > { %767 = vperm.xlu2 %1000, %v764_v8  }
  0x9d   : > { %v398_v15 = vpop.permute.xlu0 %397 }
  0x9e   : > { %v388_v16 = vpop.permute.xlu1 %387 }
  0xa5   : > { %v403_v21 = vpop.permute.xlu0 %402 }
  0xa6   : > { %v393_v22 = vpop.permute.xlu1 %392 }
  0xd6   : > { %v527_v9 = vpop.f32.mrf.mxu0 }
  0xd7   : > { %v546_v10 = vpop.f32.mrf.mxu1  ;;  %v528_v30 = vadd.f32 %v527_v9, %v388_v16  ;;  %v956_v9 = vld [vmem:[%s1353_s3 + $0x8] sm:$0xff] }
  0xd8   : > { %v547_v33 = vadd.f32 %v546_v10, %v388_v16 }
  0xd9   : > { %v594_v40 = vmax.f32 %v528_v30, 0.0  ;;  %v629_v30 = vpop.permute.xlu0 %628 }
  0xda   : > { %v595_v44 = vmax.f32 %v547_v33, 0.0 }
  0xde   : > { %v565_v11 = vpop.f32.mrf.mxu2  ;;  %v529_v13 = vpop.f32.mrf.mxu0 }
  0xdf   : > { %v584_v12 = vpop.f32.mrf.mxu3  ;;  %v548_v14 = vpop.f32.mrf.mxu1  ;;  %v530_v31 = vadd.f32 %v529_v13, %v393_v22  ;;  %v566_v55 = vadd.f32 %v565_v11, %v388_v16 }
  0xe0   : > { %v549_v34 = vadd.f32 %v548_v14, %v393_v22  ;;  %v585_v60 = vadd.f32 %v584_v12, %v388_v16 }
  0xe1   : > { %v598_v41 = vmax.f32 %v530_v31, 0.0  ;;  %v596_v4 = vmax.f32 %v566_v55, 0.0 }
  0xe2   : > { %v599_v45 = vmax.f32 %v549_v34, 0.0  ;;  %v597_v5 = vmax.f32 %v585_v60, 0.0 }
  0xe3   : > { %v614_v54 = vpack.c.bf16 %v598_v41, %v594_v40 }
  0xe4   : > { %v615_v58 = vpack.c.bf16 %v599_v45, %v595_v44 }
  0xe6   : > { %v567_v17 = vpop.f32.mrf.mxu2  ;;  %v532_v19 = vpop.f32.mrf.mxu0 }
  0xe7   : > { %v586_v18 = vpop.f32.mrf.mxu3  ;;  %v551_v20 = vpop.f32.mrf.mxu1  ;;  %v533_v23 = vadd.f32 %v532_v19, %v398_v15  ;;  %v568_v49 = vadd.f32 %v567_v17, %v393_v22 }
  0xe8   : > { %v552_v25 = vadd.f32 %v551_v20, %v398_v15  ;;  %v587_v52 = vadd.f32 %v586_v18, %v393_v22 }
  0xe9   : > { %v602_v35 = vmax.f32 %v533_v23, 0.0  ;;  %v600_v63 = vmax.f32 %v568_v49, 0.0  ;;  %v634_v23 = vpop.permute.xlu1 %633 }
  0xea   : > { %v603_v37 = vmax.f32 %v552_v25, 0.0  ;;  %v601_v1 = vmax.f32 %v587_v52, 0.0 }
  0xeb   : > { %v616_v6 = vpack.c.bf16 %v600_v63, %v596_v4 }
  0xec   : > { %v617_v7 = vpack.c.bf16 %v601_v1, %v597_v5 }
  0xee   : > { %v570_v24 = vpop.f32.mrf.mxu2  ;;  %v534_v27 = vpop.f32.mrf.mxu0 }
  0xef   : > { %v589_v26 = vpop.f32.mrf.mxu3  ;;  %v535_v28 = vadd.f32 %v534_v27, %v403_v21  ;;  %v553_v29 = vpop.f32.mrf.mxu1  ;;  %v571_v42 = vadd.f32 %v570_v24, %v398_v15 }
  0xf0   : > { %v554_v32 = vadd.f32 %v553_v29, %v403_v21  ;;  %v590_v47 = vadd.f32 %v589_v26, %v398_v15  ;;  %v639_v15 = vpop.permute.xlu2 %638 }
  0xf1   : > { %v606_v36 = vmax.f32 %v535_v28, 0.0  ;;  %v604_v56 = vmax.f32 %v571_v42, 0.0 }
  0xf2   : > { %v607_v38 = vmax.f32 %v554_v32, 0.0  ;;  %v605_v61 = vmax.f32 %v590_v47, 0.0 }
  0xf3   : > { %v618_v39 = vpack.c.bf16 %v606_v36, %v602_v35 }
  0xf4   : > { %v619_v43 = vpack.c.bf16 %v607_v38, %v603_v37 }
  0xf5   : > { %669 = vmatpush.bf16.msrb.mxu0 %v618_v39 }
  0xf6   : > { %v572_v48 = vpop.f32.mrf.mxu2  ;;  %688 = vmatpush.bf16.msrb.mxu1 %v619_v43 }
  0xf7   : > { %v573_v50 = vadd.f32 %v572_v48, %v403_v21  ;;  %v591_v51 = vpop.f32.mrf.mxu3  ;;  %v755_v48 = vld [vmem:[%s1355_s5] sm:$0xf] }
  0xf8   : > { %v592_v53 = vadd.f32 %v591_v51, %v403_v21  ;;  %v644_v24 = vpop.permute.xlu2 %643 }
  0xf9   : > { %v608_v57 = vmax.f32 %v573_v50, 0.0  ;;  %670 = vmatpush.bf16.msrb.mxu0 %v614_v54 }
  0xfa   : > { %v609_v62 = vmax.f32 %v592_v53, 0.0  ;;  %689 = vmatpush.bf16.msrb.mxu1 %v615_v58 }
  0xfb   : > { %v620_v0 = vpack.c.bf16 %v608_v57, %v604_v56 }
  0xfc   : > { %v621_v2 = vpack.c.bf16 %v609_v62, %v605_v61  ;;  %936 = vmatmul.msk.bf16.vlgmr.msrb.gmra.mxu0 %vm656_vm1, %v955_v59 }
  0xfd   : > { %707 = vmatpush.bf16.msrb.mxu2 %v620_v0  ;;  %938 = vmatmul.msk.bf16.vlgmr.msrb.gmra.mxu1 %vm656_vm1, %v955_v59 }
  0xfe   : > { %726 = vmatpush.bf16.msrb.mxu3 %v621_v2 }
 0x101   : > { %708 = vmatpush.bf16.msrb.mxu2 %v616_v6 }
 0x102   : > { %727 = vmatpush.bf16.msrb.mxu3 %v617_v7  ;;  %v768_v7 = vpop.permute.xlu2 %767 }
 0x104   : > { %940 = vmatmul.msk.bf16.vlgmr.msrb.gmra.mxu2 %vm656_vm1, %v955_v59 }
 0x105   : > { %942 = vmatmul.msk.bf16.vlgmr.msrb.gmra.mxu3 %vm656_vm1, %v955_v59 }
 0x10c   : > { %937 = vmatmul.msk.bf16.gmra.mxu0 %vm656_vm1, %v956_v9 }
 0x10d   : > { %939 = vmatmul.msk.bf16.gmra.mxu1 %vm656_vm1, %v956_v9 }
 0x114   : > { %941 = vmatmul.msk.bf16.gmra.mxu2 %vm656_vm1, %v956_v9 }
 0x115   : > { %943 = vmatmul.msk.bf16.gmra.mxu3 %vm656_vm1, %v956_v9 }
 0x179   : > { %v672_v10 = vpop.f32.mrf.mxu0 }
 0x17a   : > { %v691_v11 = vpop.f32.mrf.mxu1  ;;  %v673_v34 = vadd.f32 %v672_v10, %v629_v30 }
 0x17b   : > { %v692_v36 = vadd.f32 %v691_v11, %v629_v30 }
 0x17c   : > { %v739_v44 = vmax.f32 %v673_v34, 0.0 }
 0x17d   : > { %v740_v45 = vmax.f32 %v692_v36, 0.0 }
 0x181   : > { %v674_v12 = vpop.f32.mrf.mxu0 }
 0x182   : > { %v693_v13 = vpop.f32.mrf.mxu1  ;;  %v675_v26 = vadd.f32 %v674_v12, %v634_v23 }
 0x183   : > { %v694_v31 = vadd.f32 %v693_v13, %v634_v23 }
 0x184   : > { %v743_v38 = vmax.f32 %v675_v26, 0.0 }
 0x185   : > { %v744_v41 = vmax.f32 %v694_v31, 0.0 }
 0x186   : > { %v756_v46 = vpack.c.bf16 %v743_v38, %v739_v44 }
 0x187   : > { %v710_v14 = vpop.f32.mrf.mxu2  ;;  %v757_v47 = vpack.c.bf16 %v744_v41, %v740_v45 }
 0x188   : > { %v729_v16 = vpop.f32.mrf.mxu3  ;;  %v711_v57 = vadd.f32 %v710_v14, %v629_v30 }
 0x189   : > { %v677_v17 = vpop.f32.mrf.mxu0  ;;  %v730_v60 = vadd.f32 %v729_v16, %v629_v30 }
 0x18a   : > { %v696_v18 = vpop.f32.mrf.mxu1  ;;  %v678_v19 = vadd.f32 %v677_v17, %v639_v15  ;;  %v741_v3 = vmax.f32 %v711_v57, 0.0 }
 0x18b   : > { %v697_v21 = vadd.f32 %v696_v18, %v639_v15  ;;  %v742_v4 = vmax.f32 %v730_v60, 0.0 }
 0x18c   : > { %v747_v27 = vmax.f32 %v678_v19, 0.0 }
 0x18d   : > { %v748_v32 = vmax.f32 %v697_v21, 0.0 }
 0x18f   : > { %v712_v20 = vpop.f32.mrf.mxu2 }
 0x190   : > { %v731_v22 = vpop.f32.mrf.mxu3  ;;  %v713_v52 = vadd.f32 %v712_v20, %v634_v23 }
 0x191   : > { %v679_v25 = vpop.f32.mrf.mxu0  ;;  %v732_v55 = vadd.f32 %v731_v22, %v634_v23 }
 0x192   : > { %v680_v28 = vadd.f32 %v679_v25, %v644_v24  ;;  %v698_v29 = vpop.f32.mrf.mxu1  ;;  %v745_v63 = vmax.f32 %v713_v52, 0.0 }
 0x193   : > { %v699_v33 = vadd.f32 %v698_v29, %v644_v24  ;;  %v746_v1 = vmax.f32 %v732_v55, 0.0 }
 0x194   : > { %v751_v35 = vmax.f32 %v680_v28, 0.0  ;;  %v758_v5 = vpack.c.bf16 %v745_v63, %v741_v3 }
 0x195   : > { %v752_v37 = vmax.f32 %v699_v33, 0.0  ;;  %v759_v6 = vpack.c.bf16 %v746_v1, %v742_v4 }
 0x196   : > { %v760_v39 = vpack.c.bf16 %v751_v35, %v747_v27 }
 0x197   : > { %v715_v40 = vpop.f32.mrf.mxu2  ;;  %v761_v42 = vpack.c.bf16 %v752_v37, %v748_v32 }
 0x198   : > { %v734_v43 = vpop.f32.mrf.mxu3  ;;  %779 = vmatpush.bf16.msra.mxu0 %v760_v39  ;;  %v716_v49 = vadd.f32 %v715_v40, %v639_v15 }
 0x199   : > { %792 = vmatpush.bf16.msra.mxu1 %v761_v42  ;;  %v735_v50 = vadd.f32 %v734_v43, %v639_v15 }
 0x19a   : > { %v749_v58 = vmax.f32 %v716_v49, 0.0 }
 0x19b   : > { %v750_v61 = vmax.f32 %v735_v50, 0.0 }
 0x19c   : > { %780 = vmatpush.bf16.msra.mxu0 %v756_v46 }
 0x19d   : > { %793 = vmatpush.bf16.msra.mxu1 %v757_v47 }
 0x19f   : > { %v717_v51 = vpop.f32.mrf.mxu2  ;;  %944 = vmatmul.msk.bf16.vlgmr.msra.gmra.mxu0 %vm656_vm1, %v755_v48 }
 0x1a0   : > { %v718_v53 = vadd.f32 %v717_v51, %v644_v24  ;;  %v736_v54 = vpop.f32.mrf.mxu3  ;;  %945 = vmatmul.msk.bf16.vlgmr.msra.gmra.mxu1 %vm656_vm1, %v755_v48 }
 0x1a1   : > { %v737_v56 = vadd.f32 %v736_v54, %v644_v24 }
 0x1a2   : > { %v753_v59 = vmax.f32 %v718_v53, 0.0 }
 0x1a3   : > { %v754_v62 = vmax.f32 %v737_v56, 0.0 }
 0x1a4   : > { %v762_v0 = vpack.c.bf16 %v753_v59, %v749_v58 }
 0x1a5   : > { %v763_v2 = vpack.c.bf16 %v754_v62, %v750_v61 }
 0x1a6   : > { %805 = vmatpush.bf16.msra.mxu2 %v762_v0 }
 0x1a7   : > { %818 = vmatpush.bf16.msra.mxu3 %v763_v2 }
 0x1aa   : > { %806 = vmatpush.bf16.msra.mxu2 %v758_v5 }
 0x1ab   : > { %819 = vmatpush.bf16.msra.mxu3 %v759_v6 }
 0x1ad   : > { %946 = vmatmul.msk.bf16.vlgmr.msra.gmra.mxu2 %vm656_vm1, %v755_v48 }
 0x1ae   : > { %947 = vmatmul.msk.bf16.vlgmr.msra.gmra.mxu3 %vm656_vm1, %v755_v48 }
 0x21c   : > { %v782_v8 = vpop.f32.mrf.mxu0 }
 0x21d   : > { %v783_v9 = vadd.f32 %v782_v8, %v768_v7  ;;  %v795_v10 = vpop.f32.mrf.mxu1 }
 0x21e   : > { %v796_v11 = vadd.f32 %v795_v10, %v768_v7 }
 0x220   : > { %v825_v12 = vpack.c.bf16 %v796_v11, %v783_v9 }
 0x222   : > { %827 = vst [vmem:[%s272_s20] sm:$0xff] %v825_v12 }
 0x224   : > { %v784_v13 = vpop.f32.mrf.mxu0 }
 0x225   : > { %v797_v14 = vpop.f32.mrf.mxu1 }
 0x230   : > { %v808_v15 = vpop.f32.mrf.mxu2 }
 0x231   : > { %v809_v16 = vadd.f32 %v808_v15, %v768_v7  ;;  %v821_v17 = vpop.f32.mrf.mxu3 }
 0x232   : > { %v822_v18 = vadd.f32 %v821_v17, %v768_v7 }
 0x234   : > { %v826_v19 = vpack.c.bf16 %v822_v18, %v809_v16 }
 0x236   : > { %828 = vst [vmem:[%s272_s20 + $0x8] sm:$0xff] %v826_v19 }
 0x237   : > { %1028 = shalt.err (!%p1025_p3)
}
 0x238   : > { %958 = dma.vmem_to_hbm [thread:$0]  (%p1144_p5), %s844_s8, 256, %s846_s9, %s830_s13   ;;  %v810_v20 = vpop.f32.mrf.mxu2 }
 0x239   : > { %v823_v21 = vpop.f32.mrf.mxu3 }
 0x23a PF: > { %p964_p4 = scmp.ge.s32.totalorder %s1063_s27, 2  ;;  %s857_s18 = sand.u32 1, %s1051_s24  }
 0x23b   : > { %s858_s20 = scalar_lea.sflag [#allocation3], %s857_s18 }
 0x23c   : > { %p961_p7 = pnand %p964_p4, %p1148_p6 }
 0x23e   : > { %p962_p8 = pneg %p961_p7 }
 0x240   : > { %1046 = dma.done.wait (%p962_p8), %s858_s20, 256  }
 0x241   : > { %1048 = vsyncadd (%p962_p8), %s858_s20, 4294967040  ;;  %p17_p5 = scmp.ge.s32.totalorder %s1131_s30, 6   ;;  %s1360_s24 = smov %s1055_s25 }
 0x242   : > { %s1361_s25 = smov %s1059_s26  ;;  %s1362_s26 = smov %s1142_s10 }
 0x243   : > { %s1363_s27 = smov %s1131_s30  ;;  %19 = sbr.rel (!%p17_p5) target bundleno = 3 (0x3), region = 83 }
 0x248   :  { %864 = vsyncpa [#allocation3], 1 }
 0x249   :  { %866 = vsyncpa [#allocation3 + $0x1], 1 }

</bundles_post_ra>
